<compile_context>
chip_gen: v6e
topology: v6e:2x2x1
jax: 0.10.0
libtpu: 0.0.40
codegen_flags: <defaults>
</compile_context>

<pallas_src>
import functools

import jax
import jax.numpy as jnp
from jax.experimental import pallas as pl
from jax.experimental.pallas import tpu as pltpu


# ---------------------------------------------------------------------------
# Problem sizes (small, consistent with the module's __init__ / forward)
# ---------------------------------------------------------------------------
B = 2          # batch
N = 8          # query sequence length (x)
M = 16         # context sequence length
DIM = 32       # model dim (LayerNorm + to_q input + to_out output)
CTX_DIM = 32   # context dim (default(context_dim, dim) -> dim)
HEADS = 4      # heads
DIM_HEAD = 16  # per-head dim
INNER = HEADS * DIM_HEAD  # 64
SCALE = DIM_HEAD ** (-0.5)
LN_EPS = 1e-5


def _cross_attn_kernel(x_ref, ctx_ref, wq_ref, bq_ref, wctx_ref, o_ref, *,
                       batch, n_q, n_kv, heads, dim_head, dim_out, ln_eps):
    """Single invocation: whole batch resident in VMEM.

    x_ref:    (B*N, DIM)                    flattened queries
    ctx_ref:  (B*M, CTX_DIM)                flattened context
    wq_ref:   (DIM, HEADS*DIM_HEAD)         fused q weights (gamma & scale folded)
    bq_ref:   (1, HEADS*DIM_HEAD)           fused q bias    (beta  & scale folded)
    wctx_ref: (CTX_DIM, HEADS*DIM + DIM_HEAD)
              lanes [0, HEADS*DIM)      -> W_vo  (wv @ wout per head, lane-dense 128)
              lanes [HEADS*DIM, +DH)    -> wk
    o_ref:    (B*N, DIM)
    """
    x = x_ref[...]
    ctx = ctx_ref[...]

    # --- LayerNorm(x) without affine (affine folded into wq/bq) -------------
    mu = jnp.mean(x, axis=-1, keepdims=True)
    xc = x - mu
    var = jnp.mean(xc * xc, axis=-1, keepdims=True)
    z = xc * jax.lax.rsqrt(var + ln_eps)                          # (B*N, DIM)

    # --- context_norm is Identity (norm_context=False) ----------------------

    # --- ONE fused Q projection for all heads (scale/gamma/beta folded) -----
    q_all = (jnp.dot(z, wq_ref[...], preferred_element_type=jnp.float32)
             + bq_ref[...])                                       # (B*N, H*DH)

    # --- ONE fused context projection: [V@Wout | K] --------------------------
    kvp = jnp.dot(ctx, wctx_ref[...],
                  preferred_element_type=jnp.float32)             # (B*M, H*DIM+DH)
    vo_width = heads * dim_out
    vp_all = kvp[:, :vo_width]                                    # (B*M, H*DIM)
    k_all = kvp[:, vo_width:vo_width + dim_head]                  # (B*M, DH)

    # --- Stack heads on the sublane axis: row = b*H*N + h*N + n --------------
    q_stk = jnp.concatenate(
        [q_all[b * n_q:(b + 1) * n_q, h * dim_head:(h + 1) * dim_head]
         for b in range(batch) for h in range(heads)], axis=0)    # (B*H*N, DH)

    # Contract last dim of q with last dim of k (no explicit k.T).
    trans_b = (((1,), (1,)), ((), ()))

    outs = []
    for b in range(batch):
        k_b = k_all[b * n_kv:(b + 1) * n_kv, :]                   # (M, DH)
        vp_b = vp_all[b * n_kv:(b + 1) * n_kv, :]                 # (M, H*DIM)
        q_b = q_stk[b * heads * n_q:(b + 1) * heads * n_q, :]     # (H*N, DH)

        # One sim matmul + one softmax for ALL heads of this batch element.
        sim = jax.lax.dot_general(q_b, k_b, dimension_numbers=trans_b,
                                  preferred_element_type=jnp.float32)  # (H*N, M)
        sim = sim - jnp.max(sim, axis=-1, keepdims=True)
        p = jnp.exp(sim)
        attn = p * pl.reciprocal(jnp.sum(p, axis=-1, keepdims=True),
                                 approx=False)                    # (H*N, M)

        # attn_h @ (V @ Wout_h), accumulated -> final output rows for batch b.
        acc = jnp.zeros((n_q, dim_out), dtype=jnp.float32)
        for h in range(heads):
            attn_h = attn[h * n_q:(h + 1) * n_q, :]               # (N, M)
            vp_h = vp_b[:, h * dim_out:(h + 1) * dim_out]         # (M, DIM)
            acc = acc + jnp.dot(attn_h, vp_h,
                                preferred_element_type=jnp.float32)
        outs.append(acc)

    # --- Single full-width store ---------------------------------------------
    o_ref[...] = jnp.concatenate(outs, axis=0).astype(o_ref.dtype)


def prepare_params(gamma, beta, wq, wkv, wout, *, heads=HEADS,
                   dim_head=DIM_HEAD, scale=SCALE):
    """One-time (cacheable) weight preprocessing. Pure JAX, not in hot path.

    Inputs in "input @ W" convention:
      gamma, beta: (1, DIM)          LayerNorm affine
      wq:   (DIM, heads*dim_head)
      wkv:  (CTX_DIM, 2*dim_head)
      wout: (heads*dim_head, DIM)
    """
    dim = wq.shape[0]
    # Fold LayerNorm affine and the attention scale into the q projection:
    #   q = (z*gamma + beta) @ wq * scale = z @ (gamma[:,None]*wq*scale) + beta@wq*scale
    wq_f = (gamma.reshape(dim, 1) * wq) * scale                   # (DIM, INNER)
    bq_f = (beta.reshape(1, dim) @ wq) * scale                    # (1, INNER)

    wk = wkv[:, :dim_head]                                        # (CTX_DIM, DH)
    wv = wkv[:, dim_head:]                                        # (CTX_DIM, DH)
    wout_h = wout.reshape(heads, dim_head, dim)                   # (H, DH, DIM)
    # Fold to_out into the V projection: W_vo[:, h*DIM:(h+1)*DIM] = wv @ wout_h
    w_vo = jnp.concatenate([wv @ wout_h[h] for h in range(heads)], axis=1)  # (CTX, H*DIM)
    # Single lane-dense context weight: [W_vo | wk]
    w_ctx = jnp.concatenate([w_vo, wk], axis=1)                   # (CTX, H*DIM+DH)
    return wq_f, bq_f, w_ctx


def cross_attention(x, context, params, *, heads=HEADS, dim_head=DIM_HEAD):
    """Hot path. x: (B, N, DIM) f32, context: (B, M, CTX_DIM) f32,
    params: output of prepare_params (precomputed once)."""
    wq_f, bq_f, w_ctx = params
    b, n, dim = x.shape
    _, m, cdim = context.shape

    x2d = x.reshape(b * n, dim)
    ctx2d = context.reshape(b * m, cdim)

    kernel = functools.partial(_cross_attn_kernel, batch=b, n_q=n, n_kv=m,
                               heads=heads, dim_head=dim_head, dim_out=dim,
                               ln_eps=LN_EPS)

    # Tiny problem: gridless single-core form (per-grid-step overhead would
    # exceed the compute).  At production batch sizes, add grid=(B,) with
    # dimension_semantics=("parallel",) to use v7x's second TensorCore.
    vmem = pl.BlockSpec(memory_space=pltpu.MemorySpace.VMEM)
    out2d = pl.pallas_call(
        kernel,
        out_shape=jax.ShapeDtypeStruct((b * n, dim), x.dtype),
        in_specs=[vmem] * 5,
        out_specs=vmem,
    )(x2d, ctx2d, wq_f, bq_f, w_ctx)

    return out2d.reshape(b, n, dim)


# ---------------------------------------------------------------------------
# Pure-JAX reference (mirrors the PyTorch forward exactly, no folding)
# ---------------------------------------------------------------------------
def cross_attention_ref(x, context, gamma, beta, wq, wkv, wout,
                        *, heads=HEADS, dim_head=DIM_HEAD, scale=SCALE):
    mu = jnp.mean(x, axis=-1, keepdims=True)
    var = jnp.mean((x - mu) ** 2, axis=-1, keepdims=True)
    xn = (x - mu) / jnp.sqrt(var + LN_EPS) * gamma + beta
    q = jnp.einsum('bnd,de->bne', xn, wq)                         # (B,N,INNER)
    q = q.reshape(x.shape[0], x.shape[1], heads, dim_head)
    q = jnp.transpose(q, (0, 2, 1, 3)) * scale                    # (B,H,N,DH)
    kv = jnp.einsum('bmd,de->bme', context, wkv)
    k, v = kv[..., :dim_head], kv[..., dim_head:]                 # (B,M,DH)
    sim = jnp.einsum('bhid,bjd->bhij', q, k)
    sim = sim - jnp.max(sim, axis=-1, keepdims=True)
    attn = jax.nn.softmax(sim, axis=-1)
    out = jnp.einsum('bhij,bjd->bhid', attn, v)
    out = jnp.transpose(out, (0, 2, 1, 3)).reshape(x.shape[0], x.shape[1], -1)
    return jnp.einsum('bne,ed->bnd', out, wout)


if __name__ == "__main__":
    key = jax.random.PRNGKey(0)
    k_x, k_c, k_g, k_b, k_q, k_kv, k_o = jax.random.split(key, 7)

    x = jax.random.normal(k_x, (B, N, DIM), dtype=jnp.float32)
    context = jax.random.normal(k_c, (B, M, CTX_DIM), dtype=jnp.float32)

    # Deterministic synthetic parameters (shapes per nn.Module __init__).
    gamma = 1.0 + 0.1 * jax.random.normal(k_g, (1, DIM), dtype=jnp.float32)
    beta = 0.1 * jax.random.normal(k_b, (1, DIM), dtype=jnp.float32)
    wq = jax.random.normal(k_q, (DIM, INNER), dtype=jnp.float32) * (DIM ** -0.5)
    wkv = jax.random.normal(k_kv, (CTX_DIM, 2 * DIM_HEAD), dtype=jnp.float32) * (CTX_DIM ** -0.5)
    wout = jax.random.normal(k_o, (INNER, DIM), dtype=jnp.float32) * (INNER ** -0.5)

    # One-time weight preprocessing (cached; NOT part of the per-call path).
    params = jax.tree_util.tree_map(jax.block_until_ready,
                                    prepare_params(gamma, beta, wq, wkv, wout))

    out = cross_attention(x, context, params)
    out = jax.block_until_ready(out)

    ref = cross_attention_ref(x, context, gamma, beta, wq, wkv, wout)
    assert out.shape == (B, N, DIM)
    assert jnp.allclose(out, ref, atol=1e-4, rtol=1e-4), \
        f"max abs err = {jnp.max(jnp.abs(out - ref))}"

    # TODO(synk): parallel_ff=True branch (SwiGLU feed-forward) not exercised;
    # module default is parallel_ff=False so forward semantics are complete.
    print("KERNEL_OK")
</pallas_src>

<mosaic_0001>
module attributes {stable_mosaic.version = 11 : i64} {
  func.func @_cross_attn_kernel(%arg0: memref<16x32xf32, #tpu.memory_space<vmem>>, %arg1: memref<32x32xf32, #tpu.memory_space<vmem>>, %arg2: memref<32x64xf32, #tpu.memory_space<vmem>>, %arg3: memref<1x64xf32, #tpu.memory_space<vmem>>, %arg4: memref<32x144xf32, #tpu.memory_space<vmem>>, %arg5: memref<16x32xf32, #tpu.memory_space<vmem>>) attributes {dimension_semantics = [], scalar_prefetch = 0 : i64, scratch_operands = 0 : i64, tpu.core_type = #tpu.core_type<tc>} {
    %c0 = arith.constant 0 : index
    %c0_0 = arith.constant 0 : index
    %0 = vector.load %arg0[%c0, %c0_0] : memref<16x32xf32, #tpu.memory_space<vmem>>, vector<16x32xf32>
    %c0_1 = arith.constant 0 : index
    %c0_2 = arith.constant 0 : index
    %1 = vector.load %arg1[%c0_1, %c0_2] : memref<32x32xf32, #tpu.memory_space<vmem>>, vector<32x32xf32>
    %cst = arith.constant dense<0.000000e+00> : vector<16xf32>
    %2 = vector.multi_reduction <add>, %0, %cst [1] : vector<16x32xf32> to vector<16xf32>
    %3 = vector.shape_cast %2 : vector<16xf32> to vector<16x1xf32>
    %cst_3 = arith.constant 3.200000e+01 : f32
    %4 = vector.broadcast %cst_3 : f32 to vector<16x1xf32>
    %5 = arith.divf %3, %4 : vector<16x1xf32>
    %6 = vector.broadcast %5 : vector<16x1xf32> to vector<16x32xf32>
    %7 = arith.subf %0, %6 : vector<16x32xf32>
    %8 = arith.mulf %7, %7 : vector<16x32xf32>
    %cst_4 = arith.constant dense<0.000000e+00> : vector<16xf32>
    %9 = vector.multi_reduction <add>, %8, %cst_4 [1] : vector<16x32xf32> to vector<16xf32>
    %10 = vector.shape_cast %9 : vector<16xf32> to vector<16x1xf32>
    %cst_5 = arith.constant 3.200000e+01 : f32
    %11 = vector.broadcast %cst_5 : f32 to vector<16x1xf32>
    %12 = arith.divf %10, %11 : vector<16x1xf32>
    %cst_6 = arith.constant 9.99999974E-6 : f32
    %13 = vector.broadcast %cst_6 : f32 to vector<16x1xf32>
    %14 = arith.addf %12, %13 : vector<16x1xf32>
    %15 = math.rsqrt %14 : vector<16x1xf32>
    %16 = vector.broadcast %15 : vector<16x1xf32> to vector<16x32xf32>
    %17 = arith.mulf %7, %16 : vector<16x32xf32>
    %c0_7 = arith.constant 0 : index
    %c0_8 = arith.constant 0 : index
    %18 = vector.load %arg2[%c0_7, %c0_8] : memref<32x64xf32, #tpu.memory_space<vmem>>, vector<32x64xf32>
    %cst_9 = arith.constant dense<0.000000e+00> : vector<16x64xf32>
    %19 = tpu.matmul %17, %18, %cst_9 {dimension_numbers = #tpu.dot_dimension_numbers<[1], [0], [0], [1], [0, 0, 1, 1], [], []>} : vector<16x32xf32>, vector<32x64xf32>, vector<16x64xf32> -> vector<16x64xf32>
    %c0_10 = arith.constant 0 : index
    %c0_11 = arith.constant 0 : index
    %20 = vector.load %arg3[%c0_10, %c0_11] : memref<1x64xf32, #tpu.memory_space<vmem>>, vector<1x64xf32>
    %21 = vector.broadcast %20 : vector<1x64xf32> to vector<16x64xf32>
    %22 = arith.addf %19, %21 : vector<16x64xf32>
    %c0_12 = arith.constant 0 : index
    %c0_13 = arith.constant 0 : index
    %23 = vector.load %arg4[%c0_12, %c0_13] : memref<32x144xf32, #tpu.memory_space<vmem>>, vector<32x144xf32>
    %cst_14 = arith.constant dense<0.000000e+00> : vector<32x144xf32>
    %24 = tpu.matmul %1, %23, %cst_14 {dimension_numbers = #tpu.dot_dimension_numbers<[1], [0], [0], [1], [0, 0, 1, 1], [], []>} : vector<32x32xf32>, vector<32x144xf32>, vector<32x144xf32> -> vector<32x144xf32>
    %25 = vector.extract_strided_slice %24 {offsets = [0, 0], sizes = [32, 128], strides = [1, 1]} : vector<32x144xf32> to vector<32x128xf32>
    %26 = vector.extract_strided_slice %24 {offsets = [0, 128], sizes = [32, 16], strides = [1, 1]} : vector<32x144xf32> to vector<32x16xf32>
    %27 = vector.extract_strided_slice %22 {offsets = [0, 0], sizes = [8, 16], strides = [1, 1]} : vector<16x64xf32> to vector<8x16xf32>
    %28 = vector.extract_strided_slice %22 {offsets = [0, 16], sizes = [8, 16], strides = [1, 1]} : vector<16x64xf32> to vector<8x16xf32>
    %29 = vector.extract_strided_slice %22 {offsets = [0, 32], sizes = [8, 16], strides = [1, 1]} : vector<16x64xf32> to vector<8x16xf32>
    %30 = vector.extract_strided_slice %22 {offsets = [0, 48], sizes = [8, 16], strides = [1, 1]} : vector<16x64xf32> to vector<8x16xf32>
    %31 = vector.extract_strided_slice %22 {offsets = [8, 0], sizes = [8, 16], strides = [1, 1]} : vector<16x64xf32> to vector<8x16xf32>
    %32 = vector.extract_strided_slice %22 {offsets = [8, 16], sizes = [8, 16], strides = [1, 1]} : vector<16x64xf32> to vector<8x16xf32>
    %33 = vector.extract_strided_slice %22 {offsets = [8, 32], sizes = [8, 16], strides = [1, 1]} : vector<16x64xf32> to vector<8x16xf32>
    %34 = vector.extract_strided_slice %22 {offsets = [8, 48], sizes = [8, 16], strides = [1, 1]} : vector<16x64xf32> to vector<8x16xf32>
    %35 = tpu.concatenate %27, %28, %29, %30, %31, %32, %33, %34 in 0 : vector<8x16xf32>, vector<8x16xf32>, vector<8x16xf32>, vector<8x16xf32>, vector<8x16xf32>, vector<8x16xf32>, vector<8x16xf32>, vector<8x16xf32> -> vector<64x16xf32>
    %36 = vector.extract_strided_slice %26 {offsets = [0, 0], sizes = [16, 16], strides = [1, 1]} : vector<32x16xf32> to vector<16x16xf32>
    %37 = vector.extract_strided_slice %25 {offsets = [0, 0], sizes = [16, 128], strides = [1, 1]} : vector<32x128xf32> to vector<16x128xf32>
    %38 = vector.extract_strided_slice %35 {offsets = [0, 0], sizes = [32, 16], strides = [1, 1]} : vector<64x16xf32> to vector<32x16xf32>
    %cst_15 = arith.constant dense<0.000000e+00> : vector<32x16xf32>
    %39 = tpu.matmul %38, %36, %cst_15 {dimension_numbers = #tpu.dot_dimension_numbers<[1], [1], [0], [0], [0, 0, 1, 0], [], []>} : vector<32x16xf32>, vector<16x16xf32>, vector<32x16xf32> -> vector<32x16xf32>
    %cst_16 = arith.constant dense<0xFF800000> : vector<32xf32>
    %40 = vector.multi_reduction <maximumf>, %39, %cst_16 [1] : vector<32x16xf32> to vector<32xf32>
    %41 = vector.shape_cast %40 : vector<32xf32> to vector<32x1xf32>
    %42 = vector.broadcast %41 : vector<32x1xf32> to vector<32x16xf32>
    %43 = arith.subf %39, %42 : vector<32x16xf32>
    %44 = math.exp %43 : vector<32x16xf32>
    %cst_17 = arith.constant dense<0.000000e+00> : vector<32xf32>
    %45 = vector.multi_reduction <add>, %44, %cst_17 [1] : vector<32x16xf32> to vector<32xf32>
    %46 = vector.shape_cast %45 : vector<32xf32> to vector<32x1xf32>
    %47 = tpu.reciprocal %46 : vector<32x1xf32> -> vector<32x1xf32>
    %48 = vector.broadcast %47 : vector<32x1xf32> to vector<32x16xf32>
    %49 = arith.mulf %44, %48 : vector<32x16xf32>
    %cst_18 = arith.constant 0.000000e+00 : f32
    %50 = vector.broadcast %cst_18 : f32 to vector<8x32xf32>
    %51 = vector.extract_strided_slice %49 {offsets = [0, 0], sizes = [8, 16], strides = [1, 1]} : vector<32x16xf32> to vector<8x16xf32>
    %52 = vector.extract_strided_slice %37 {offsets = [0, 0], sizes = [16, 32], strides = [1, 1]} : vector<16x128xf32> to vector<16x32xf32>
    %cst_19 = arith.constant dense<0.000000e+00> : vector<8x32xf32>
    %53 = tpu.matmul %51, %52, %cst_19 {dimension_numbers = #tpu.dot_dimension_numbers<[1], [0], [0], [1], [0, 0, 1, 1], [], []>} : vector<8x16xf32>, vector<16x32xf32>, vector<8x32xf32> -> vector<8x32xf32>
    %54 = arith.addf %50, %53 : vector<8x32xf32>
    %55 = vector.extract_strided_slice %49 {offsets = [8, 0], sizes = [8, 16], strides = [1, 1]} : vector<32x16xf32> to vector<8x16xf32>
    %56 = vector.extract_strided_slice %37 {offsets = [0, 32], sizes = [16, 32], strides = [1, 1]} : vector<16x128xf32> to vector<16x32xf32>
    %cst_20 = arith.constant dense<0.000000e+00> : vector<8x32xf32>
    %57 = tpu.matmul %55, %56, %cst_20 {dimension_numbers = #tpu.dot_dimension_numbers<[1], [0], [0], [1], [0, 0, 1, 1], [], []>} : vector<8x16xf32>, vector<16x32xf32>, vector<8x32xf32> -> vector<8x32xf32>
    %58 = arith.addf %54, %57 : vector<8x32xf32>
    %59 = vector.extract_strided_slice %49 {offsets = [16, 0], sizes = [8, 16], strides = [1, 1]} : vector<32x16xf32> to vector<8x16xf32>
    %60 = vector.extract_strided_slice %37 {offsets = [0, 64], sizes = [16, 32], strides = [1, 1]} : vector<16x128xf32> to vector<16x32xf32>
    %cst_21 = arith.constant dense<0.000000e+00> : vector<8x32xf32>
    %61 = tpu.matmul %59, %60, %cst_21 {dimension_numbers = #tpu.dot_dimension_numbers<[1], [0], [0], [1], [0, 0, 1, 1], [], []>} : vector<8x16xf32>, vector<16x32xf32>, vector<8x32xf32> -> vector<8x32xf32>
    %62 = arith.addf %58, %61 : vector<8x32xf32>
    %63 = vector.extract_strided_slice %49 {offsets = [24, 0], sizes = [8, 16], strides = [1, 1]} : vector<32x16xf32> to vector<8x16xf32>
    %64 = vector.extract_strided_slice %37 {offsets = [0, 96], sizes = [16, 32], strides = [1, 1]} : vector<16x128xf32> to vector<16x32xf32>
    %cst_22 = arith.constant dense<0.000000e+00> : vector<8x32xf32>
    %65 = tpu.matmul %63, %64, %cst_22 {dimension_numbers = #tpu.dot_dimension_numbers<[1], [0], [0], [1], [0, 0, 1, 1], [], []>} : vector<8x16xf32>, vector<16x32xf32>, vector<8x32xf32> -> vector<8x32xf32>
    %66 = arith.addf %62, %65 : vector<8x32xf32>
    %67 = vector.extract_strided_slice %26 {offsets = [16, 0], sizes = [16, 16], strides = [1, 1]} : vector<32x16xf32> to vector<16x16xf32>
    %68 = vector.extract_strided_slice %25 {offsets = [16, 0], sizes = [16, 128], strides = [1, 1]} : vector<32x128xf32> to vector<16x128xf32>
    %69 = vector.extract_strided_slice %35 {offsets = [32, 0], sizes = [32, 16], strides = [1, 1]} : vector<64x16xf32> to vector<32x16xf32>
    %cst_23 = arith.constant dense<0.000000e+00> : vector<32x16xf32>
    %70 = tpu.matmul %69, %67, %cst_23 {dimension_numbers = #tpu.dot_dimension_numbers<[1], [1], [0], [0], [0, 0, 1, 0], [], []>} : vector<32x16xf32>, vector<16x16xf32>, vector<32x16xf32> -> vector<32x16xf32>
    %cst_24 = arith.constant dense<0xFF800000> : vector<32xf32>
    %71 = vector.multi_reduction <maximumf>, %70, %cst_24 [1] : vector<32x16xf32> to vector<32xf32>
    %72 = vector.shape_cast %71 : vector<32xf32> to vector<32x1xf32>
    %73 = vector.broadcast %72 : vector<32x1xf32> to vector<32x16xf32>
    %74 = arith.subf %70, %73 : vector<32x16xf32>
    %75 = math.exp %74 : vector<32x16xf32>
    %cst_25 = arith.constant dense<0.000000e+00> : vector<32xf32>
    %76 = vector.multi_reduction <add>, %75, %cst_25 [1] : vector<32x16xf32> to vector<32xf32>
    %77 = vector.shape_cast %76 : vector<32xf32> to vector<32x1xf32>
    %78 = tpu.reciprocal %77 : vector<32x1xf32> -> vector<32x1xf32>
    %79 = vector.broadcast %78 : vector<32x1xf32> to vector<32x16xf32>
    %80 = arith.mulf %75, %79 : vector<32x16xf32>
    %cst_26 = arith.constant 0.000000e+00 : f32
    %81 = vector.broadcast %cst_26 : f32 to vector<8x32xf32>
    %82 = vector.extract_strided_slice %80 {offsets = [0, 0], sizes = [8, 16], strides = [1, 1]} : vector<32x16xf32> to vector<8x16xf32>
    %83 = vector.extract_strided_slice %68 {offsets = [0, 0], sizes = [16, 32], strides = [1, 1]} : vector<16x128xf32> to vector<16x32xf32>
    %cst_27 = arith.constant dense<0.000000e+00> : vector<8x32xf32>
    %84 = tpu.matmul %82, %83, %cst_27 {dimension_numbers = #tpu.dot_dimension_numbers<[1], [0], [0], [1], [0, 0, 1, 1], [], []>} : vector<8x16xf32>, vector<16x32xf32>, vector<8x32xf32> -> vector<8x32xf32>
    %85 = arith.addf %81, %84 : vector<8x32xf32>
    %86 = vector.extract_strided_slice %80 {offsets = [8, 0], sizes = [8, 16], strides = [1, 1]} : vector<32x16xf32> to vector<8x16xf32>
    %87 = vector.extract_strided_slice %68 {offsets = [0, 32], sizes = [16, 32], strides = [1, 1]} : vector<16x128xf32> to vector<16x32xf32>
    %cst_28 = arith.constant dense<0.000000e+00> : vector<8x32xf32>
    %88 = tpu.matmul %86, %87, %cst_28 {dimension_numbers = #tpu.dot_dimension_numbers<[1], [0], [0], [1], [0, 0, 1, 1], [], []>} : vector<8x16xf32>, vector<16x32xf32>, vector<8x32xf32> -> vector<8x32xf32>
    %89 = arith.addf %85, %88 : vector<8x32xf32>
    %90 = vector.extract_strided_slice %80 {offsets = [16, 0], sizes = [8, 16], strides = [1, 1]} : vector<32x16xf32> to vector<8x16xf32>
    %91 = vector.extract_strided_slice %68 {offsets = [0, 64], sizes = [16, 32], strides = [1, 1]} : vector<16x128xf32> to vector<16x32xf32>
    %cst_29 = arith.constant dense<0.000000e+00> : vector<8x32xf32>
    %92 = tpu.matmul %90, %91, %cst_29 {dimension_numbers = #tpu.dot_dimension_numbers<[1], [0], [0], [1], [0, 0, 1, 1], [], []>} : vector<8x16xf32>, vector<16x32xf32>, vector<8x32xf32> -> vector<8x32xf32>
    %93 = arith.addf %89, %92 : vector<8x32xf32>
    %94 = vector.extract_strided_slice %80 {offsets = [24, 0], sizes = [8, 16], strides = [1, 1]} : vector<32x16xf32> to vector<8x16xf32>
    %95 = vector.extract_strided_slice %68 {offsets = [0, 96], sizes = [16, 32], strides = [1, 1]} : vector<16x128xf32> to vector<16x32xf32>
    %cst_30 = arith.constant dense<0.000000e+00> : vector<8x32xf32>
    %96 = tpu.matmul %94, %95, %cst_30 {dimension_numbers = #tpu.dot_dimension_numbers<[1], [0], [0], [1], [0, 0, 1, 1], [], []>} : vector<8x16xf32>, vector<16x32xf32>, vector<8x32xf32> -> vector<8x32xf32>
    %97 = arith.addf %93, %96 : vector<8x32xf32>
    %98 = tpu.concatenate %66, %97 in 0 : vector<8x32xf32>, vector<8x32xf32> -> vector<16x32xf32>
    %c0_31 = arith.constant 0 : index
    %c0_32 = arith.constant 0 : index
    %99 = vector.load %arg5[%c0_31, %c0_32] : memref<16x32xf32, #tpu.memory_space<vmem>>, vector<16x32xf32>
    tpu.vector_store %arg5[%c0_31, %c0_32], %98 {strides = array<i32>} : memref<16x32xf32, #tpu.memory_space<vmem>>, vector<16x32xf32>,
    return
  }
}

</mosaic_0001>

<bundles_post_ra>
// kernel: tpu_custom_call.1
= control target key start
LH: loop header
LB: loop body
LE: loop exit
PB: predicated region body
PF: predicated region fallthrough
CT: control target
= control target key end

     0   :  { %10 = vsyncpa [#allocation3], 0  ;;  %s1799_s0 = inlined_call_operand.hbm [shape: f32[16,32], index: 0, kind: input, shape index: {}]   ;;  %s1800_s1 = inlined_call_operand.hbm [shape: f32[32,32], index: 1, kind: input, shape index: {}]   ;;  %s1801_s2 = inlined_call_operand.hbm [shape: f32[32,64], index: 2, kind: input, shape index: {}]   ;;  %s1802_s3 = inlined_call_operand.vmem [shape: f32[1,64], index: 3, kind: input, shape index: {}]   ;;  %s1803_s4 = inlined_call_operand.hbm [shape: f32[32,144], index: 4, kind: input, shape index: {}]   ;;  %s1804_s5 = inlined_call_operand.hbm [shape: f32[16,32], index: 5, kind: output, shape index: {}]  }
   0x1   :  { %11 = vsyncpa [#allocation6], 0 }
   0x2   :  { %12 = vsyncpa [#allocation9], 0 }
   0x3   :  { %13 = vsyncpa [#allocation4], 0  ;;  %s1577_s18 = smov [#allocation5]   ;;  %s1578_s20 = smov [#allocation2]  }
   0x4   :  { %s31_s19 = sshll.u32 %s1577_s18, 4  ;;  %s19_s21 = sshll.u32 %s1578_s20, 4  ;;  %s32_s19 = int_to_ptr.vmem [resolvable:$true] %s31_s19  ;;  %s20_s21 = int_to_ptr.vmem [resolvable:$true] %s19_s21 }
   0x5   :  { %s1477_s22 = scalar_lea.vmem %s32_s19, 512  ;;  %p1482_p1 = scmp.lt.s32.totalorder %s32_s19, %s32_s19 }
   0x6   :  { %p1478_p0 = scmp.ne.s32.totalorder %s32_s19, %s1477_s22  ;;  %p1483_p2 = scmp.lt.s32.totalorder %s1477_s22, %s1477_s22 }
   0x8   :  { %p1484_p3 = por %p1483_p2, %p1482_p1 }
   0xa   :  { %p1485_p4 = pnand %p1484_p3, %p1478_p0 }
   0xc   :  { %1488 = shalt.err (!%p1485_p4)
}
   0xd   :  { %s1579_s23 = smov 128   ;;  %s1580_s24 = smov 8  }
   0xe   :  { %37 = dma.hbm_to_vmem [thread:$0]  %s1800_s1, 512, %s32_s19, [#allocation6], %s1579_s23, %s1579_s23, %s1580_s24  }
   0xf   :  { %s1497_s27 = scalar_lea.vmem %s20_s21, 256  ;;  %p1502_p6 = scmp.lt.s32.totalorder %s20_s21, %s20_s21 }
  0x10   :  { %p1498_p5 = scmp.ne.s32.totalorder %s20_s21, %s1497_s27  ;;  %p1503_p7 = scmp.lt.s32.totalorder %s1497_s27, %s1497_s27 }
  0x12   :  { %p1504_p8 = por %p1503_p7, %p1502_p6 }
  0x14   :  { %p1505_p9 = pnand %p1504_p8, %p1498_p5 }
  0x16   :  { %1508 = shalt.err (!%p1505_p9)
}
  0x17   :  { %25 = dma.hbm_to_vmem [thread:$0]  %s1799_s0, 256, %s20_s21, [#allocation3], %s1579_s23, %s1579_s23, %s1580_s24  }
  0x18   :  { %s1581_s30 = smov [#allocation7]   ;;  %s1582_s7 = smov [#allocation8]  }
  0x19   :  { %s43_s6 = sshll.u32 %s1581_s30, 4  ;;  %s57_s8 = sshll.u32 %s1582_s7, 4  ;;  %s44_s6 = int_to_ptr.vmem [resolvable:$true] %s43_s6  ;;  %s58_s8 = int_to_ptr.vmem [resolvable:$true] %s57_s8 }
  0x1a   :  { %s1517_s1 = scalar_lea.vmem %s44_s6, 512  ;;  %p1522_p11 = scmp.lt.s32.totalorder %s44_s6, %s44_s6 }
  0x1b   :  { %p1518_p10 = scmp.ne.s32.totalorder %s44_s6, %s1517_s1  ;;  %p1523_p12 = scmp.lt.s32.totalorder %s1517_s1, %s1517_s1 }
  0x1d   :  { %p1524_p13 = por %p1523_p12, %p1522_p11 }
  0x1f   :  { %p1525_p0 = pnand %p1524_p13, %p1518_p10 }
  0x21   :  { %1528 = shalt.err (!%p1525_p0)
}
  0x22   :  { %49 = dma.hbm_to_vmem [thread:$0]  %s1801_s2, 512, %s44_s6, [#allocation6], %s1579_s23, %s1579_s23, %s1580_s24  }
  0x23   :  { %s1537_s0 = scalar_lea.vmem %s58_s8, 1024  ;;  %p1542_p2 = scmp.lt.s32.totalorder %s58_s8, %s58_s8 }
  0x24   :  { %p1538_p1 = scmp.ne.s32.totalorder %s58_s8, %s1537_s0  ;;  %p1543_p3 = scmp.lt.s32.totalorder %s1537_s0, %s1537_s0 }
  0x26   :  { %p1544_p4 = por %p1543_p3, %p1542_p2 }
  0x28   :  { %p1545_p5 = pnand %p1544_p4, %p1538_p1 }
  0x2a   :  { %1548 = shalt.err (!%p1545_p5)
}
  0x2b   :  { %s1583_s11 = smov 256   ;;  %s1584_s12 = smov 16  }
  0x2c   :  { %63 = dma.hbm_to_vmem [thread:$0]  %s1803_s4, 1024, %s58_s8, [#allocation9], %s1583_s11, %s1583_s11, %s1584_s12  }
  0x2d   :  { %1569 = dma.done.wait [#allocation3], 256  }
  0x2e   :  { %1570 = vsyncadd [#allocation3], 4294967040 }
  0x2f   :  { %1571 = dma.done.wait [#allocation6], 1024  }
  0x30   :  { %1572 = vsyncadd [#allocation6], 4294966272 }
  0x31   :  { %1573 = dma.done.wait [#allocation9], 1024  }
  0x32   :  { %1574 = vsyncadd [#allocation9], 4294966272  ;;  %vm82_vm0 = vcmask 261120   ;;  %v76_v0 = vld [vmem:[#allocation2] sm:$0xff]  ;;  %v77_v1 = vld [vmem:[#allocation2 + $0x8] sm:$0xff]  ;;  %v1585_v22 = vmov 0.0  }
  0x33   :  { %v83_v2 = vsel %vm82_vm0, %v76_v0, 0.0  ;;  %v86_v3 = vsel %vm82_vm0, %v77_v1, 0.0  ;;  %v113_v14 = vld [vmem:[#allocation7 + $0x18] sm:$0xff]  ;;  %v112_v15 = vld [vmem:[#allocation7 + $0x10] sm:$0xff]  ;;  %v111_v16 = vld [vmem:[#allocation7 + $0x8] sm:$0xff]  ;;  %286 = vmatprep.mubr.f32.mxu1 %v1585_v22  ;;  %vm325_vm1 = vcmask 130048  }
  0x34   :  { %84 = vadd.xlane.f32.xlu0 %v83_v2  ;;  %1330 = vmatprep.subr.mxu0 %v113_v14  ;;  %v110_v17 = vld [vmem:[#allocation7] sm:$0xff]  ;;  %v209_v18 = vld [vmem:[#allocation8 + $0x38] sm:$0xff]  ;;  %v208_v19 = vld [vmem:[#allocation8 + $0x30] sm:$0xff]  ;;  %s1586_s15 = smov 96   ;;  %s1587_s16 = smov 112   ;;  %vm1590_vm2 = vmmov 0  }
  0x35   :  { %1331 = vmatpush3.msra.mxu0 %v113_v14  ;;  %v207_v20 = vld [vmem:[#allocation8 + $0x28] sm:$0xff]  ;;  %246 = vmatprep.subr.mxu1 %v209_v18  ;;  %v206_v21 = vld [vmem:[#allocation8 + $0x20] sm:$0xff]  ;;  %v205_v23 = vld [vmem:[#allocation8 + $0x18] sm:$0xff]  ;;  %s1588_s17 = smov 80   ;;  %s1591_s18 = smov 32  }
  0x36   :  { %1332 = vmatprep.subr.mxu0 %v112_v15  ;;  %247 = vmatpush1.msra.mxu1 %v208_v19  ;;  %v204_v24 = vld [vmem:[#allocation8 + $0x10] sm:$0xff]  ;;  %v203_v25 = vld [vmem:[#allocation8 + $0x8] sm:$0xff]  ;;  %v202_v26 = vld [vmem:[#allocation8] sm:$0xff]  ;;  %s1592_s19 = smov [#allocation10]  }
  0x37   :  { %1333 = vmatpush3.msra.mxu0 %v112_v15  ;;  %248 = vmatprep.subr.mxu1 %v207_v20  ;;  %v78_v27 = vld [vmem:[#allocation5] sm:$0xff]  ;;  %v79_v28 = vld [vmem:[#allocation5 + $0x8] sm:$0xff]  ;;  %v1261_v43 = vld [vmem:[%s1802_s3] ss:$0 sm:$0xff]  ;;  %s1589_s3 = smov 64   ;;  %s1247_s20 = sshll.u32 %s1592_s19, 4  ;;  %s1248_s20 = int_to_ptr.vmem [resolvable:$true] %s1247_s20 }
  0x38   :  { %87 = vadd.xlane.f32.xlu0 %v86_v3  ;;  %1334 = vmatprep.subr.mxu0 %v111_v16  ;;  %v80_v51 = vld [vmem:[#allocation5 + $0x10] sm:$0xff]  ;;  %v81_v52 = vld [vmem:[#allocation5 + $0x18] sm:$0xff]  ;;  %s1549_s21 = scalar_lea.vmem %s1248_s20, 256  ;;  %p1554_p7 = scmp.lt.s32.totalorder %s1248_s20, %s1248_s20 }
  0x39   :  { %1335 = vmatpush3.msra.mxu0 %v111_v16  ;;  %249 = vmatpush1.msra.mxu1 %v206_v21  ;;  %p1550_p6 = scmp.ne.s32.totalorder %s1248_s20, %s1549_s21  ;;  %p1555_p8 = scmp.lt.s32.totalorder %s1549_s21, %s1549_s21 }
  0x3a   :  { %1336 = vmatprep.subr.mxu0 %v110_v17  ;;  %250 = vmatprep.subr.mxu1 %v205_v23 }
  0x3b   :  { %1337 = vmatpush3.msra.mxu0 %v110_v17  ;;  %251 = vmatpush1.msra.mxu1 %v204_v24  ;;  %p1556_p9 = por %p1555_p8, %p1554_p7 }
  0x3c   :  { %252 = vmatprep.subr.mxu1 %v203_v25 }
  0x3d   :  { %253 = vmatpush1.msra.mxu1 %v202_v26  ;;  %p1557_p10 = pnand %p1556_p9, %p1550_p6 }
  0x3e   :  { %1264 = vmatmul.mubr.msk.f32.vlgmr.msra.gmra.mxu1 %vm82_vm0, %v78_v27  ;;  %1358 = vmatprep.subr.mxu1 %v1585_v22 }
  0x3f   :  { %292 = vmatprep.mubr.f32.mxu1 %v1585_v22 }
  0x42   :  { %1265 = vmatmul.mubr.msk.f32.gmra.mxu1 %vm82_vm0, %v79_v28 }
  0x43   :  { %298 = vmatprep.mubr.f32.mxu1 %v1585_v22 }
  0x46   :  { %1266 = vmatmul.mubr.msk.f32.gmra.mxu1 %vm82_vm0, %v80_v51 }
  0x47   :  { %304 = vmatprep.mubr.f32.mxu1 %v1585_v22 }
  0x4a   :  { %1267 = vmatmul.mubr.msk.f32.gmra.mxu1 %vm82_vm0, %v81_v52 }
  0x4b   :  { %1362 = vmatprep.mubr.msk.f32.mxu1 %vm1590_vm2, %v1585_v22 }
  0xbd   :  { %v85_v4 = vpop.xlane.xlu0 %84 }
  0xbe   :  { %v90_v5 = vmul.f32 0.03125, %v85_v4 }
  0xc0   :  { %v92_v6 = vsub.f32 %v76_v0, %v90_v5 }
  0xc1   :  { %v88_v7 = vpop.xlane.xlu0 %87 }
  0xc2   :  { %v91_v8 = vmul.f32 0.03125, %v88_v7  ;;  %v94_v9 = vmul.f32 %v92_v6, %v92_v6 }
  0xc4   :  { %v93_v10 = vsub.f32 %v77_v1, %v91_v8  ;;  %v96_v11 = vsel %vm82_vm0, %v94_v9, 0.0 }
  0xc5   :  { %97 = vadd.xlane.f32.xlu1 %v96_v11 }
  0xc6   :  { %v95_v12 = vmul.f32 %v93_v10, %v93_v10 }
  0xc8   :  { %v99_v13 = vsel %vm82_vm0, %v95_v12, 0.0 }
  0xc9   :  { %100 = vadd.xlane.f32.xlu1 %v99_v13 }
  0xfe   :  { %v1656_v39 = vpop.f32.mrf.mxu1 }
 0x100   :  { %v290_v40 = vpop.f32.mrf.mxu1 }
 0x102   :  { %v1658_v41 = vpop.f32.mrf.mxu1 }
 0x103   :  { %1359 = vmatpush3.msra.mxu1 %v1658_v41 }
 0x104   :  { %v296_v42 = vpop.f32.mrf.mxu1  ;;  %1360 = vmatprep.subr.mxu1 %v1585_v22 }
 0x105   :  { %1341 = vmatprep.subr.msk.mxu0 %vm325_vm1, %v296_v42  ;;  %1361 = vmatpush3.msra.mxu1 %v1656_v39 }
 0x106   :  { %1372 = vmatprep.subr.mxu1 %v1585_v22 }
 0x14e   :  { %v98_v29 = vpop.xlane.xlu1 %97 }
 0x14f   :  { %v102_v30 = vmul.f32 0.03125, %v98_v29 }
 0x151   :  { %v104_v31 = vadd.f32 1e-05, %v102_v30 }
 0x152   :  { %v101_v32 = vpop.xlane.xlu1 %100 }
 0x153   :  { %1433 = vrsqrt.f32 %v104_v31  ;;  %v103_v33 = vmul.f32 0.03125, %v101_v32 }
 0x155   :  { %v105_v34 = vadd.f32 1e-05, %v103_v33 }
 0x157   :  { %1435 = vrsqrt.f32 %v105_v34 }
 0x160   :  { %v1434_v35 = vpop.eup %1433 }
 0x161   :  { %v108_v36 = vmul.f32 %v1434_v35, %v92_v6 }
 0x163   :  { %1338 = vmatprep.mubr.msk.f32.mxu0 %vm82_vm0, %v108_v36 }
 0x164   :  { %v1436_v37 = vpop.eup %1435 }
 0x165   :  { %v109_v38 = vmul.f32 %v1436_v37, %v93_v10  ;;  %v1711_v10 = vpop.f32.mrf.mxu1 }
 0x167   :  { %1339 = vmatmul.mubr.msk.f32.vlgmr.msra.gmra.mxu0 %vm82_vm0, %v109_v38  ;;  %v302_v12 = vpop.f32.mrf.mxu1 }
 0x168   :  { %1342 = vmatpush3.xpose.msk.msra.mxu0 %vm325_vm1, %v296_v42 }
 0x169   :  { %1343 = vmatprep.subr.msk.mxu0 %vm325_vm1, %v290_v40  ;;  %v1714_v15 = vpop.f32.mrf.mxu1 }
 0x16b   :  { %v308_v17 = vpop.f32.mrf.mxu1 }
 0x16c   :  { %1344 = vmatpush3.xpose.msk.msra.mxu0 %vm325_vm1, %v290_v40 }
 0x16d   :  { %1351 = vmatprep.subr.mxu0 %v1585_v22 }
 0x227   :  { %v1340_v44 = vpop.f32.mrf.mxu0 }
 0x228   :  { %v1672_v45 = vadd.f32 %v1340_v44, %v1261_v43 }
 0x229   :  { %v193_v46 = vpop.f32.mrf.mxu0 }
 0x22a   :  { %v194_v47 = vadd.f32 %v1261_v43, %v193_v46 }
 0x22c   :  { %314 = vrot.lane.b32.xlu1 %v194_v47, %s1586_s15  ;;  %312 = vrot.lane.b32.xlu0 %v194_v47, %s1587_s16 }
 0x22d   :  { %1345 = vmatprep.mubr.msk.f32.mxu0 %vm325_vm1, %v194_v47 }
 0x230   :  { %316 = vrot.lane.b32.xlu1 %v194_v47, %s1588_s17 }
 0x29e   :  { %v315_v48 = vpop.permute.xlu1 %314  ;;  %v313_v49 = vpop.permute.xlu0 %312 }
 0x29f   :  { %1346 = vmatmul.mubr.msk.f32.vlgmr.msra.gmra.mxu0 %vm325_vm1, %v313_v49 }
 0x2a0   :  { %1348 = vmatprep.mubr.msk.f32.mxu0 %vm325_vm1, %v315_v48 }
 0x2a2   :  { %v317_v50 = vpop.permute.xlu1 %316 }
 0x2a3   :  { %1349 = vmatmul.mubr.msk.f32.gmra.mxu0 %vm325_vm1, %v317_v50 }
 0x2a4   :  { %1355 = vmatprep.mubr.msk.f32.mxu0 %vm1590_vm2, %v1585_v22 }
 0x35f   :  { %v1347_v53 = vpop.f32.mrf.mxu0 }
 0x360   :  { %v428_v54 = vsel %vm325_vm1, %v1347_v53, -inf }
 0x361   :  { %429 = vmax.xlane.f32.xlu1 %v428_v54  ;;  %v1683_v55 = vpop.f32.mrf.mxu0 }
 0x362   :  { %v425_v7 = vsel %vm325_vm1, %v1683_v55, -inf }
 0x363   :  { %v1685_v56 = vpop.f32.mrf.mxu0 }
 0x364   :  { %v434_v59 = vsel %vm325_vm1, %v1685_v56, -inf }
 0x365   :  { %v416_v57 = vpop.f32.mrf.mxu0 }
 0x366   :  { %v431_v58 = vsel %vm325_vm1, %v416_v57, -inf }
 0x367   :  { %432 = vmax.xlane.f32.xlu0 %v431_v58 }
 0x372   :  { %473 = vrot.lane.b32.xlu1 %v1658_v41, %s1586_s15 }
 0x376   :  { %625 = vrot.lane.b32.xlu1 %v1658_v41, %s1589_s3 }
 0x37a   :  { %623 = vrot.lane.b32.xlu1 %v1656_v39, %s1589_s3 }
 0x37e   :  { %319 = vrot.lane.b32.xlu1 %v1672_v45, %s1587_s16 }
 0x382   :  { %323 = vrot.lane.b32.xlu1 %v1672_v45, %s1588_s17 }
 0x3a6   :  { %435 = vmax.xlane.f32.xlu1 %v434_v59 }
 0x3ea   :  { %v430_v60 = vpop.xlane.xlu1 %429 }
 0x3eb   :  { %v438_v61 = vsub.f32 %v1347_v53, %v430_v60 }
 0x3ed   :  { %v443_v62 = vmul.f32 1.442695, %v438_v61 }
 0x3ee   :  { %v474_v63 = vpop.permute.xlu1 %473 }
 0x3ef   :  { %1437 = vpow2.f32 %v443_v62  ;;  %1352 = vmatpush3.msra.mxu0 %v474_v63 }
 0x3f0   :  { %v433_v0 = vpop.xlane.xlu0 %432  ;;  %1353 = vmatprep.subr.mxu0 %v1585_v22 }
 0x3f1   :  { %v439_v1 = vsub.f32 %v416_v57, %v433_v0 }
 0x3f2   :  { %v626_v13 = vpop.permute.xlu1 %625 }
 0x3f3   :  { %v445_v2 = vmul.f32 1.442695, %v439_v1 }
 0x3f5   :  { %1439 = vpow2.f32 %v445_v2 }
 0x3f6   :  { %v624_v18 = vpop.permute.xlu1 %623 }
 0x3fa   :  { %v320_v21 = vpop.permute.xlu1 %319 }
 0x3fc   :  { %v1438_v3 = vpop.eup %1437 }
 0x3fd   :  { %v452_v4 = vsel %vm325_vm1, %v1438_v3, 0.0 }
 0x3fe   :  { %453 = vadd.xlane.f32.xlu0 %v452_v4  ;;  %v324_v24 = vpop.permute.xlu1 %323 }
 0x402   :  { %v1440_v5 = vpop.eup %1439 }
 0x403   :  { %v455_v6 = vsel %vm325_vm1, %v1440_v5, 0.0 }
 0x404   :  { %456 = vadd.xlane.f32.xlu0 %v455_v6 }
 0x41a   :  { %471 = vrot.lane.b32.xlu0 %v1656_v39, %s1586_s15 }
 0x41e   :  { %321 = vrot.lane.b32.xlu0 %v1672_v45, %s1586_s15 }
 0x42f   :  { %v436_v25 = vpop.xlane.xlu1 %435 }
 0x430   :  { %v440_v26 = vsub.f32 %v1685_v56, %v436_v25 }
 0x432   :  { %v447_v30 = vmul.f32 1.442695, %v440_v26 }
 0x43d   :  { %426 = vmax.xlane.f32.xlu0 %v425_v7 }
 0x487   :  { %v454_v8 = vpop.xlane.xlu0 %453 }
 0x488   :  { %1441 = vrcp.f32 %v454_v8 }
 0x48d   :  { %v457_v9 = vpop.xlane.xlu0 %456 }
 0x48e   :  { %1443 = vrcp.f32 %v457_v9 }
 0x48f   :  { %1445 = vpow2.f32 %v447_v30 }
 0x491   :  { %v472_v11 = vpop.permute.xlu0 %471 }
 0x492   :  { %1354 = vmatpush3.msra.mxu0 %v472_v11 }
 0x493   :  { %1365 = vmatprep.subr.mxu0 %v1585_v22 }
 0x495   :  { %v1442_v14 = vpop.eup %1441  ;;  %v322_v23 = vpop.permute.xlu0 %321 }
 0x496   :  { %v466_v16 = vmul.f32 %v1442_v14, %v1438_v3 }
 0x498   :  { %1356 = vmatmul.mubr.msk.f32.vlgmr.msra.gmra.mxu0 %vm325_vm1, %v466_v16 }
 0x499   :  { %1366 = vmatpush3.msra.mxu0 %v626_v13  ;;  %1369 = vmatprep.mubr.msk.f32.mxu0 %vm1590_vm2, %v1585_v22 }
 0x49a   :  { %1367 = vmatprep.subr.mxu0 %v1585_v22 }
 0x49b   :  { %v1444_v19 = vpop.eup %1443  ;;  %1368 = vmatpush3.msra.mxu0 %v624_v18 }
 0x49c   :  { %1379 = vmatprep.subr.msk.mxu0 %vm325_vm1, %v308_v17  ;;  %v467_v20 = vmul.f32 %v1444_v19, %v1440_v5  ;;  %v1446_v43 = vpop.eup %1445 }
 0x49e   :  { %1370 = vmatmul.mubr.msk.f32.vlgmr.msra.gmra.mxu0 %vm325_vm1, %v467_v20 }
 0x49f   :  { %1380 = vmatpush3.xpose.msk.msra.mxu0 %vm325_vm1, %v308_v17  ;;  %1383 = vmatprep.mubr.msk.f32.mxu0 %vm325_vm1, %v1672_v45  ;;  %v458_v45 = vsel %vm325_vm1, %v1446_v43, 0.0 }
 0x4a0   :  { %1381 = vmatprep.subr.msk.mxu0 %vm325_vm1, %v302_v12 }
 0x4a3   :  { %1382 = vmatpush3.xpose.msk.msra.mxu0 %vm325_vm1, %v302_v12 }
 0x4a4   :  { %1410 = vmatprep.subr.mxu0 %v1585_v22 }
 0x4a6   :  { %1384 = vmatmul.mubr.msk.f32.vlgmr.msra.gmra.mxu0 %vm325_vm1, %v320_v21 }
 0x4a7   :  { %1386 = vmatprep.mubr.msk.f32.mxu0 %vm325_vm1, %v322_v23 }
 0x4aa   :  { %1387 = vmatmul.mubr.msk.f32.gmra.mxu0 %vm325_vm1, %v324_v24 }
 0x4ab   :  { %1414 = vmatprep.mubr.msk.f32.mxu0 %vm1590_vm2, %v1585_v22 }
 0x4c6   :  { %v427_v27 = vpop.xlane.xlu0 %426 }
 0x4c7   :  { %v437_v31 = vsub.f32 %v1683_v55, %v427_v27 }
 0x4c9   :  { %v441_v33 = vmul.f32 1.442695, %v437_v31 }
 0x4cb   :  { %1447 = vpow2.f32 %v441_v33 }
 0x4d8   :  { %v1448_v47 = vpop.eup %1447 }
 0x4d9   :  { %v449_v48 = vsel %vm325_vm1, %v1448_v47, 0.0 }
 0x558   :  { %v1734_v28 = vpop.f32.mrf.mxu0 }
 0x55a   :  { %v1357_v29 = vpop.f32.mrf.mxu0 }
 0x55e   :  { %v1737_v32 = vpop.f32.mrf.mxu0 }
 0x560   :  { %v1371_v34 = vpop.f32.mrf.mxu0 }
 0x566   :  { %v1385_v35 = vpop.f32.mrf.mxu0 }
 0x567   :  { %v885_v36 = vsel %vm325_vm1, %v1385_v35, -inf }
 0x568   :  { %886 = vmax.xlane.f32.xlu0 %v885_v36  ;;  %v863_v37 = vpop.f32.mrf.mxu0 }
 0x569   :  { %v882_v40 = vsel %vm325_vm1, %v863_v37, -inf }
 0x56a   :  { %v1388_v38 = vpop.f32.mrf.mxu0 }
 0x56b   :  { %v891_v42 = vsel %vm325_vm1, %v1388_v38, -inf }
 0x56c   :  { %883 = vmax.xlane.f32.xlu0 %v882_v40  ;;  %892 = vmax.xlane.f32.xlu1 %v891_v42  ;;  %v873_v44 = vpop.f32.mrf.mxu0 }
 0x56d   :  { %v888_v46 = vsel %vm325_vm1, %v873_v44, -inf }
 0x570   :  { %459 = vadd.xlane.f32.xlu1 %v458_v45  ;;  %889 = vmax.xlane.f32.xlu0 %v888_v46 }
 0x574   :  { %450 = vadd.xlane.f32.xlu0 %v449_v48 }
 0x581   :  { %703 = vrot.lane.b32.xlu1 %v1656_v39, %s1591_s18 }
 0x585   :  { %930 = vrot.lane.b32.xlu1 %v1714_v15, %s1586_s15 }
 0x589   :  { %928 = vrot.lane.b32.xlu1 %v1711_v10, %s1586_s15 }
 0x58a   :  { %705 = vrot.lane.b32.xlu0 %v1658_v41, %s1591_s18 }
 0x58d   :  { %1080 = vrot.lane.b32.xlu1 %v1711_v10, %s1589_s3 }
 0x58e   :  { %1082 = vrot.lane.b32.xlu0 %v1714_v15, %s1589_s3 }
 0x5f1   :  { %v887_v49 = vpop.xlane.xlu0 %886 }
 0x5f2   :  { %v895_v50 = vsub.f32 %v1385_v35, %v887_v49 }
 0x5f4   :  { %v900_v51 = vmul.f32 1.442695, %v895_v50 }
 0x5f5   :  { %v893_v52 = vpop.xlane.xlu1 %892  ;;  %v884_v39 = vpop.xlane.xlu0 %883 }
 0x5f6   :  { %1449 = vpow2.f32 %v900_v51  ;;  %v897_v53 = vsub.f32 %v1388_v38, %v893_v52  ;;  %v894_v54 = vsub.f32 %v863_v37, %v884_v39 }
 0x5f8   :  { %v898_v55 = vmul.f32 1.442695, %v894_v54  ;;  %v904_v56 = vmul.f32 1.442695, %v897_v53 }
 0x5f9   :  { %v890_v57 = vpop.xlane.xlu0 %889  ;;  %v460_v60 = vpop.xlane.xlu1 %459 }
 0x5fa   :  { %v896_v58 = vsub.f32 %v873_v44, %v890_v57  ;;  %1451 = vpow2.f32 %v898_v55 }
 0x5fb   :  { %1453 = vpow2.f32 %v904_v56 }
 0x5fc   :  { %v902_v41 = vmul.f32 1.442695, %v896_v58 }
 0x5fd   :  { %v451_v59 = vpop.xlane.xlu0 %450  ;;  %v704_v0 = vpop.permute.xlu1 %703 }
 0x5fe   :  { %1455 = vpow2.f32 %v902_v41 }
 0x5ff   :  { %1457 = vrcp.f32 %v451_v59 }
 0x600   :  { %1459 = vrcp.f32 %v460_v60 }
 0x601   :  { %v931_v9 = vpop.permute.xlu1 %930  ;;  %v706_v11 = vpop.permute.xlu0 %705 }
 0x603   :  { %v1450_v61 = vpop.eup %1449 }
 0x604   :  { %v909_v62 = vsel %vm325_vm1, %v1450_v61, 0.0 }
 0x605   :  { %910 = vadd.xlane.f32.xlu0 %v909_v62  ;;  %v929_v13 = vpop.permute.xlu1 %928  ;;  %v1083_v14 = vpop.permute.xlu0 %1082 }
 0x607   :  { %v1452_v63 = vpop.eup %1451 }
 0x608   :  { %v906_v1 = vsel %vm325_vm1, %v1452_v63, 0.0  ;;  %v1454_v2 = vpop.eup %1453 }
 0x609   :  { %907 = vadd.xlane.f32.xlu1 %v906_v1  ;;  %v915_v7 = vsel %vm325_vm1, %v1454_v2, 0.0  ;;  %v1081_v17 = vpop.permute.xlu1 %1080 }
 0x60b   :  { %v1456_v3 = vpop.eup %1455 }
 0x60c   :  { %v1458_v4 = vpop.eup %1457  ;;  %v912_v5 = vsel %vm325_vm1, %v1456_v3, 0.0 }
 0x60d   :  { %v465_v6 = vmul.f32 %v1458_v4, %v1448_v47  ;;  %913 = vadd.xlane.f32.xlu0 %v912_v5  ;;  %v1460_v8 = vpop.eup %1459  ;;  %916 = vadd.xlane.f32.xlu1 %v915_v7 }
 0x60e   :  { %v468_v12 = vmul.f32 %v1460_v8, %v1446_v43 }
 0x60f   :  { %1363 = vmatmul.mubr.msk.f32.vlgmr.msra.gmra.mxu1 %vm325_vm1, %v465_v6 }
 0x610   :  { %1373 = vmatpush3.msra.mxu1 %v706_v11  ;;  %1376 = vmatprep.mubr.msk.f32.mxu1 %vm1590_vm2, %v1585_v22 }
 0x611   :  { %1374 = vmatprep.subr.mxu1 %v1585_v22 }
 0x612   :  { %1375 = vmatpush3.msra.mxu1 %v704_v0 }
 0x613   :  { %1389 = vmatprep.subr.mxu1 %v1585_v22  ;;  %1377 = vmatmul.mubr.msk.f32.vlgmr.msra.gmra.mxu1 %vm325_vm1, %v468_v12 }
 0x614   :  { %1390 = vmatpush3.msra.mxu1 %v931_v9  ;;  %1393 = vmatprep.mubr.msk.f32.mxu1 %vm1590_vm2, %v1585_v22 }
 0x615   :  { %1391 = vmatprep.subr.mxu1 %v1585_v22 }
 0x616   :  { %1392 = vmatpush3.msra.mxu1 %v929_v13 }
 0x617   :  { %1396 = vmatprep.subr.mxu1 %v1585_v22 }
 0x61e   :  { %1160 = vrot.lane.b32.xlu1 %v1711_v10, %s1591_s18 }
 0x623   :  { %1162 = vrot.lane.b32.xlu0 %v1714_v15, %s1591_s18 }
 0x68e   :  { %v911_v16 = vpop.xlane.xlu0 %910 }
 0x68f   :  { %1461 = vrcp.f32 %v911_v16 }
 0x692   :  { %v908_v18 = vpop.xlane.xlu1 %907 }
 0x693   :  { %1463 = vrcp.f32 %v908_v18 }
 0x696   :  { %v914_v19 = vpop.xlane.xlu0 %913  ;;  %v917_v20 = vpop.xlane.xlu1 %916 }
 0x697   :  { %1465 = vrcp.f32 %v914_v19 }
 0x698   :  { %1467 = vrcp.f32 %v917_v20 }
 0x69a   :  { %v1163_v21 = vpop.permute.xlu0 %1162  ;;  %v1161_v24 = vpop.permute.xlu1 %1160 }
 0x69b   :  { %1411 = vmatpush3.msra.mxu0 %v1163_v21 }
 0x69c   :  { %v1462_v23 = vpop.eup %1461  ;;  %1412 = vmatprep.subr.mxu0 %v1585_v22 }
 0x69d   :  { %1413 = vmatpush3.msra.mxu0 %v1161_v24  ;;  %v923_v25 = vmul.f32 %v1462_v23, %v1450_v61 }
 0x69f   :  { %1394 = vmatmul.mubr.msk.f32.vlgmr.msra.gmra.mxu1 %vm325_vm1, %v923_v25 }
 0x6a0   :  { %1397 = vmatpush3.msra.mxu1 %v1714_v15  ;;  %1400 = vmatprep.mubr.msk.f32.mxu1 %vm1590_vm2, %v1585_v22  ;;  %v1464_v26 = vpop.eup %1463 }
 0x6a1   :  { %1398 = vmatprep.subr.mxu1 %v1585_v22  ;;  %v922_v27 = vmul.f32 %v1464_v26, %v1452_v63 }
 0x6a2   :  { %1399 = vmatpush3.msra.mxu1 %v1711_v10 }
 0x6a3   :  { %1403 = vmatprep.subr.mxu1 %v1585_v22  ;;  %1401 = vmatmul.mubr.msk.f32.vlgmr.msra.gmra.mxu1 %vm325_vm1, %v922_v27 }
 0x6a4   :  { %v1466_v29 = vpop.eup %1465  ;;  %1404 = vmatpush3.msra.mxu1 %v1083_v14  ;;  %1407 = vmatprep.mubr.msk.f32.mxu1 %vm1590_vm2, %v1585_v22 }
 0x6a5   :  { %v1468_v30 = vpop.eup %1467  ;;  %v924_v15 = vmul.f32 %v1466_v29, %v1456_v3  ;;  %1405 = vmatprep.subr.mxu1 %v1585_v22 }
 0x6a6   :  { %v925_v31 = vmul.f32 %v1468_v30, %v1454_v2  ;;  %1406 = vmatpush3.msra.mxu1 %v1081_v17 }
 0x6a7   :  { %1408 = vmatmul.mubr.msk.f32.vlgmr.msra.gmra.mxu1 %vm325_vm1, %v924_v15 }
 0x6a8   :  { %1415 = vmatmul.mubr.msk.f32.vlgmr.msra.gmra.mxu0 %vm325_vm1, %v925_v31 }
 0x6cf   :  { %v619_v10 = vpop.f32.mrf.mxu1 }
 0x6d0   :  { %v620_v33 = vadd.f32 %v619_v10, %v1734_v28 }
 0x6d1   :  { %v1364_v34 = vpop.f32.mrf.mxu1 }
 0x6d2   :  { %v702_v35 = vadd.f32 %v1737_v32, %v620_v33 }
 0x6d3   :  { %v778_v36 = vpop.f32.mrf.mxu1 }
 0x6d4   :  { %v782_v37 = vadd.f32 %v778_v36, %v702_v35 }
 0x6d5   :  { %v1378_v38 = vpop.f32.mrf.mxu1 }
 0x6d6   :  { %1240 = vst.msk [vmem:[#allocation10] sm:$0xff] %vm82_vm0, %v782_v37 }
 0x75f   :  { %v1003_v40 = vpop.f32.mrf.mxu1 }
 0x761   :  { %v1395_v42 = vpop.f32.mrf.mxu1 }
 0x763   :  { %v1076_v43 = vpop.f32.mrf.mxu1 }
 0x764   :  { %v1077_v44 = vadd.f32 %v1076_v43, %v1003_v40 }
 0x765   :  { %v1402_v22 = vpop.f32.mrf.mxu1 }
 0x767   :  { %v1155_v45 = vpop.f32.mrf.mxu1 }
 0x768   :  { %v1235_v46 = vpop.f32.mrf.mxu0  ;;  %v1159_v47 = vadd.f32 %v1155_v45, %v1077_v44 }
 0x769   :  { %v1409_v48 = vpop.f32.mrf.mxu1 }
 0x76a   :  { %v1416_v28 = vpop.f32.mrf.mxu0  ;;  %v1239_v49 = vadd.f32 %v1235_v46, %v1159_v47 }
 0x76c   :  { %1241 = vst.msk [vmem:[#allocation10 + $0x8] sm:$0xff] %vm82_vm0, %v1239_v49 }
 0x76d   :  { %1560 = shalt.err (!%p1557_p10)
}
 0x76e   :  { %1253 = dma.vmem_to_hbm [thread:$0]  %s1248_s20, 256, %s1804_s5, [#allocation4], %s1579_s23, %s1579_s23, %s1580_s24  }
 0x76f   :  { %1575 = dma.done.wait [#allocation4], 256  }
 0x770   :  { %1576 = vsyncadd [#allocation4], 4294967040 }
 0x771   :  { %1257 = vsyncpa [#allocation3], 1 }
 0x772   :  { %1258 = vsyncpa [#allocation6], 1 }
 0x773   :  { %1259 = vsyncpa [#allocation9], 1 }
 0x774   :  { %1260 = vsyncpa [#allocation4], 1 }

</bundles_post_ra>
